<compile_context>
chip_gen: v7x
topology: tpu7x:2x2x1
jax: 0.10.0
libtpu: 0.0.40
codegen_flags: <defaults>
</compile_context>

<pallas_src>
import functools

import jax
import jax.numpy as jnp
from jax.experimental import pallas as pl
from jax.experimental.pallas import tpu as pltpu


# ---------------------------------------------------------------------------
# Filter construction (matches get_blur_filter semantics; tiny, done in JAX)
# ---------------------------------------------------------------------------

def get_blur_taps_1d(sqrt_sigma, kernel_size):
    """1-D taps w with f[dy, dx] = w[dx] (every row of the normalized filter)."""
    sigma = sqrt_sigma ** 2
    lin = jnp.linspace(-1.0, 1.0, kernel_size)
    g = jnp.exp(-(lin ** 2) / (2.0 * sigma ** 2))
    norm = jnp.sqrt(jnp.sum(g * g))
    return (g / jnp.maximum(norm, 1e-12)).astype(jnp.float32)


def get_blur_filter_2d(sqrt_sigma, kernel_size):
    """Exact torch construction of the (k, k) filter (used by the reference)."""
    sigma = sqrt_sigma ** 2
    lin = jnp.linspace(-1.0, 1.0, kernel_size)
    xx, yy = jnp.meshgrid(lin, lin, indexing="xy")
    f = jnp.exp(-(xx ** 2 + yy ** 2) / (2.0 * sigma ** 2))
    # F.normalize default: p=2, dim=1, eps=1e-12  -> per-row L2 normalization
    norm = jnp.sqrt(jnp.sum(f * f, axis=1, keepdims=True))
    return (f / jnp.maximum(norm, 1e-12)).astype(jnp.float32)


# ---------------------------------------------------------------------------
# Pallas kernel: fused channel-sum + in-kernel 'same' pad + separable blur
# ---------------------------------------------------------------------------

def _blur_kernel(w_ref, x_ref, o_ref, pad_ref, *, k, pad_t, pad_l):
    # w_ref  : (k,) f32 taps in SMEM
    # x_ref  : (Bt, C, H, W) input tile in VMEM
    # o_ref  : (Bt, C, H, W) output tile in VMEM
    # pad_ref: (Bt, H+k-1, W+k-1) f32 VMEM scratch (zero-padded channel sum)
    Bt, C, H, W = o_ref.shape

    # --- in-kernel 'same' padding: zero scratch, write channel sum into interior
    pad_ref[...] = jnp.zeros_like(pad_ref)
    x = x_ref[...].astype(jnp.float32)
    s = jnp.sum(x, axis=1)                                    # (Bt, H, W)
    pad_ref[:, pad_t:pad_t + H, pad_l:pad_l + W] = s

    p = pad_ref[...]                                          # (Bt, Hp, Wp)

    # --- vertical pass: unweighted k-row sum (rows of f are identical)
    v = p[:, 0:H, :]
    for dy in range(1, k):
        v = v + p[:, dy:dy + H, :]                            # (Bt, H, Wp)

    # --- horizontal pass: k-tap weighted sum, scalar taps from SMEM
    acc = w_ref[0] * v[:, :, 0:W]
    for dx in range(1, k):
        acc = acc + w_ref[dx] * v[:, :, dx:dx + W]            # (Bt, H, W)

    # --- all C output channels are identical: one broadcast store
    o_ref[...] = jnp.broadcast_to(
        acc[:, None, :, :], (Bt, C, H, W)).astype(o_ref.dtype)


@functools.partial(jax.jit, static_argnames=("kernel_size",))
def blur_layer(x, sqrt_sigma, kernel_size=5):
    """x: (B, C, H, W) f32 NCHW (PyTorch layout) -> (B, C, H, W) blurred."""
    B, C, H, W = x.shape
    k = kernel_size
    pad_t = (k - 1) // 2      # top/left pad for 'same' (stride 1)
    pad_l = (k - 1) // 2
    Hp, Wp = H + k - 1, W + k - 1

    w = get_blur_taps_1d(sqrt_sigma, k)                       # (k,) taps, SMEM

    # --- choose batch block: ~1 MiB input tile per step, keep >= 2 grid steps
    # when B allows so both TensorCores (v7x / megacore) stay busy.
    itemsize = jnp.dtype(x.dtype).itemsize
    per_img_bytes = C * H * W * itemsize
    budget = 1 << 20
    divisors = [d for d in range(1, B + 1) if B % d == 0]
    fit = [d for d in divisors if d * per_img_bytes <= budget]
    bt = fit[-1] if fit else 1
    if bt == B and B >= 2:
        bt = max(d for d in divisors if d <= B // 2)
    grid = (B // bt,)

    return pl.pallas_call(
        functools.partial(_blur_kernel, k=k, pad_t=pad_t, pad_l=pad_l),
        out_shape=jax.ShapeDtypeStruct((B, C, H, W), x.dtype),
        grid=grid,
        in_specs=[
            # k taps live in SMEM; read as scalars inside the kernel.
            pl.BlockSpec(memory_space=pltpu.MemorySpace.SMEM),
            # Bt unpadded images per grid step (no XLA-side pad).
            pl.BlockSpec((bt, C, H, W), lambda i: (i, 0, 0, 0)),
        ],
        out_specs=pl.BlockSpec((bt, C, H, W), lambda i: (i, 0, 0, 0)),
        scratch_shapes=[pltpu.VMEM((bt, Hp, Wp), jnp.float32)],
        compiler_params=pltpu.CompilerParams(
            dimension_semantics=("parallel",),
            vmem_limit_bytes=32 * 1024 * 1024,
        ),
    )(w, x)


# ---------------------------------------------------------------------------
# Pure-JAX reference (mirrors F.conv2d with the full (3,3,k,k) stacked weight)
# ---------------------------------------------------------------------------

def blur_layer_reference(x, sqrt_sigma, kernel_size=5):
    B, C, H, W = x.shape
    k = kernel_size
    f2d = get_blur_filter_2d(sqrt_sigma, k)
    wgt = jnp.broadcast_to(f2d[None, None], (C, C, k, k)).astype(jnp.float32)
    pad_lo, pad_hi = (k - 1) // 2, k // 2
    return jax.lax.conv_general_dilated(
        x, wgt, window_strides=(1, 1),
        padding=((pad_lo, pad_hi), (pad_lo, pad_hi)),
        dimension_numbers=("NCHW", "OIHW", "NCHW"),
        precision=jax.lax.Precision.HIGHEST)


if __name__ == "__main__":
    key = jax.random.PRNGKey(0)
    B, C, H, W = 2, 3, 16, 16                   # in_channels must be 3 (filter is 3x3xkxk)
    x = jax.random.normal(key, (B, C, H, W), dtype=jnp.float32)
    sqrt_sigma = jnp.float32(1.0)               # sqrt_sigma_initial

    out = jax.block_until_ready(blur_layer(x, sqrt_sigma))

    assert out.shape == (B, C, H, W), out.shape
    assert bool(jnp.all(jnp.isfinite(out)))

    ref = jax.block_until_ready(blur_layer_reference(x, sqrt_sigma))
    max_err = float(jnp.max(jnp.abs(out - ref)))
    assert max_err < 1e-4, f"mismatch vs reference conv: {max_err}"

    print("KERNEL_OK")
</pallas_src>

<mosaic_0001>
module attributes {stable_mosaic.version = 11 : i64} {
  func.func @_blur_kernel(%arg0: i32, %arg1: memref<5xf32, #tpu.memory_space<smem>>, %arg2: memref<1x3x16x16xf32, #tpu.memory_space<vmem>>, %arg3: memref<1x3x16x16xf32, #tpu.memory_space<vmem>>, %arg4: memref<1x20x20xf32, #tpu.memory_space<vmem>>) attributes {dimension_semantics = [#tpu.dimension_semantics<parallel>], iteration_bounds = array<i64: 2>, scalar_prefetch = 0 : i64, scratch_operands = 1 : i64, tpu.core_type = #tpu.core_type<tc>, window_params = [{transform_indices = @transform_0, window_bounds = array<i64: 5>}, {transform_indices = @transform_1, window_bounds = array<i64: 1, 3, 16, 16>}, {transform_indices = @transform_2, window_bounds = array<i64: 1, 3, 16, 16>}]} {
    %cst = arith.constant 0.000000e+00 : f32
    %0 = vector.broadcast %cst : f32 to vector<1x20x20xf32>
    %c0 = arith.constant 0 : index
    %c0_0 = arith.constant 0 : index
    %c0_1 = arith.constant 0 : index
    %1 = vector.load %arg4[%c0, %c0_0, %c0_1] : memref<1x20x20xf32, #tpu.memory_space<vmem>>, vector<1x20x20xf32>
    tpu.vector_store %arg4[%c0, %c0_0, %c0_1], %0 {strides = array<i32>} : memref<1x20x20xf32, #tpu.memory_space<vmem>>, vector<1x20x20xf32>,
    %c0_2 = arith.constant 0 : index
    %c0_3 = arith.constant 0 : index
    %c0_4 = arith.constant 0 : index
    %c0_5 = arith.constant 0 : index
    %2 = vector.load %arg2[%c0_2, %c0_3, %c0_4, %c0_5] : memref<1x3x16x16xf32, #tpu.memory_space<vmem>>, vector<1x3x16x16xf32>
    %cst_6 = arith.constant dense<0.000000e+00> : vector<1x16x16xf32>
    %3 = vector.multi_reduction <add>, %2, %cst_6 [1] : vector<1x3x16x16xf32> to vector<1x16x16xf32>
    %c0_7 = arith.constant 0 : index
    %c2 = arith.constant 2 : index
    %c2_8 = arith.constant 2 : index
    %4 = vector.load %arg4[%c0_7, %c2, %c2_8] : memref<1x20x20xf32, #tpu.memory_space<vmem>>, vector<1x16x16xf32>
    tpu.vector_store %arg4[%c0_7, %c2, %c2_8], %3 {strides = array<i32>} : memref<1x20x20xf32, #tpu.memory_space<vmem>>, vector<1x16x16xf32>,
    %c0_9 = arith.constant 0 : index
    %c0_10 = arith.constant 0 : index
    %c0_11 = arith.constant 0 : index
    %5 = vector.load %arg4[%c0_9, %c0_10, %c0_11] : memref<1x20x20xf32, #tpu.memory_space<vmem>>, vector<1x20x20xf32>
    %6 = vector.extract_strided_slice %5 {offsets = [0, 0, 0], sizes = [1, 16, 20], strides = [1, 1, 1]} : vector<1x20x20xf32> to vector<1x16x20xf32>
    %7 = vector.extract_strided_slice %5 {offsets = [0, 1, 0], sizes = [1, 16, 20], strides = [1, 1, 1]} : vector<1x20x20xf32> to vector<1x16x20xf32>
    %8 = arith.addf %6, %7 : vector<1x16x20xf32>
    %9 = vector.extract_strided_slice %5 {offsets = [0, 2, 0], sizes = [1, 16, 20], strides = [1, 1, 1]} : vector<1x20x20xf32> to vector<1x16x20xf32>
    %10 = arith.addf %8, %9 : vector<1x16x20xf32>
    %11 = vector.extract_strided_slice %5 {offsets = [0, 3, 0], sizes = [1, 16, 20], strides = [1, 1, 1]} : vector<1x20x20xf32> to vector<1x16x20xf32>
    %12 = arith.addf %10, %11 : vector<1x16x20xf32>
    %13 = vector.extract_strided_slice %5 {offsets = [0, 4, 0], sizes = [1, 16, 20], strides = [1, 1, 1]} : vector<1x20x20xf32> to vector<1x16x20xf32>
    %14 = arith.addf %12, %13 : vector<1x16x20xf32>
    %c0_12 = arith.constant 0 : index
    %15 = memref.load %arg1[%c0_12] : memref<5xf32, #tpu.memory_space<smem>>
    %16 = vector.extract_strided_slice %14 {offsets = [0, 0, 0], sizes = [1, 16, 16], strides = [1, 1, 1]} : vector<1x16x20xf32> to vector<1x16x16xf32>
    %17 = vector.broadcast %15 : f32 to vector<1x16x16xf32>
    %18 = arith.mulf %17, %16 : vector<1x16x16xf32>
    %c1 = arith.constant 1 : index
    %19 = memref.load %arg1[%c1] : memref<5xf32, #tpu.memory_space<smem>>
    %20 = vector.extract_strided_slice %14 {offsets = [0, 0, 1], sizes = [1, 16, 16], strides = [1, 1, 1]} : vector<1x16x20xf32> to vector<1x16x16xf32>
    %21 = vector.broadcast %19 : f32 to vector<1x16x16xf32>
    %22 = arith.mulf %21, %20 : vector<1x16x16xf32>
    %23 = arith.addf %18, %22 : vector<1x16x16xf32>
    %c2_13 = arith.constant 2 : index
    %24 = memref.load %arg1[%c2_13] : memref<5xf32, #tpu.memory_space<smem>>
    %25 = vector.extract_strided_slice %14 {offsets = [0, 0, 2], sizes = [1, 16, 16], strides = [1, 1, 1]} : vector<1x16x20xf32> to vector<1x16x16xf32>
    %26 = vector.broadcast %24 : f32 to vector<1x16x16xf32>
    %27 = arith.mulf %26, %25 : vector<1x16x16xf32>
    %28 = arith.addf %23, %27 : vector<1x16x16xf32>
    %c3 = arith.constant 3 : index
    %29 = memref.load %arg1[%c3] : memref<5xf32, #tpu.memory_space<smem>>
    %30 = vector.extract_strided_slice %14 {offsets = [0, 0, 3], sizes = [1, 16, 16], strides = [1, 1, 1]} : vector<1x16x20xf32> to vector<1x16x16xf32>
    %31 = vector.broadcast %29 : f32 to vector<1x16x16xf32>
    %32 = arith.mulf %31, %30 : vector<1x16x16xf32>
    %33 = arith.addf %28, %32 : vector<1x16x16xf32>
    %c4 = arith.constant 4 : index
    %34 = memref.load %arg1[%c4] : memref<5xf32, #tpu.memory_space<smem>>
    %35 = vector.extract_strided_slice %14 {offsets = [0, 0, 4], sizes = [1, 16, 16], strides = [1, 1, 1]} : vector<1x16x20xf32> to vector<1x16x16xf32>
    %36 = vector.broadcast %34 : f32 to vector<1x16x16xf32>
    %37 = arith.mulf %36, %35 : vector<1x16x16xf32>
    %38 = arith.addf %33, %37 : vector<1x16x16xf32>
    %39 = vector.shape_cast %38 : vector<1x16x16xf32> to vector<1x1x16x16xf32>
    %40 = vector.shape_cast %39 : vector<1x1x16x16xf32> to vector<1x1x16x16xf32>
    %41 = vector.broadcast %40 : vector<1x1x16x16xf32> to vector<1x3x16x16xf32>
    %c0_14 = arith.constant 0 : index
    %c0_15 = arith.constant 0 : index
    %c0_16 = arith.constant 0 : index
    %c0_17 = arith.constant 0 : index
    %42 = vector.load %arg3[%c0_14, %c0_15, %c0_16, %c0_17] : memref<1x3x16x16xf32, #tpu.memory_space<vmem>>, vector<1x3x16x16xf32>
    tpu.vector_store %arg3[%c0_14, %c0_15, %c0_16, %c0_17], %41 {strides = array<i32>} : memref<1x3x16x16xf32, #tpu.memory_space<vmem>>, vector<1x3x16x16xf32>,
    return
  }
  func.func @transform_0(%arg0: i32) -> i32 {
    %c0_i32 = arith.constant 0 : i32
    %c0_i32_0 = arith.constant 0 : i32
    return %c0_i32 : i32
  }
  func.func @transform_1(%arg0: i32) -> (i32, i32, i32, i32) {
    %c0_i32 = arith.constant 0 : i32
    %c0_i32_0 = arith.constant 0 : i32
    %c0_i32_1 = arith.constant 0 : i32
    %c0_i32_2 = arith.constant 0 : i32
    return %arg0, %c0_i32, %c0_i32_0, %c0_i32_1 : i32, i32, i32, i32
  }
  func.func @transform_2(%arg0: i32) -> (i32, i32, i32, i32) {
    %c0_i32 = arith.constant 0 : i32
    %c0_i32_0 = arith.constant 0 : i32
    %c0_i32_1 = arith.constant 0 : i32
    %c0_i32_2 = arith.constant 0 : i32
    return %arg0, %c0_i32, %c0_i32_0, %c0_i32_1 : i32, i32, i32, i32
  }
}

</mosaic_0001>

<bundles_post_ra>
// kernel: blur_layer.1
= control target key start
LH: loop header
LB: loop body
LE: loop exit
PB: predicated region body
PF: predicated region fallthrough
CT: control target
= control target key end

     0   :  { %7 = vsyncpa [#allocation6], 0  ;;  %s868_s0 = inlined_call_operand.vmem [shape: f32[5], index: 0, kind: input, shape index: {}]   ;;  %s869_s1 = inlined_call_operand.hbm [shape: f32[2,3,16,16], index: 1, kind: input, shape index: {}]   ;;  %s870_s2 = inlined_call_operand.hbm [shape: f32[2,3,16,16], index: 2, kind: output, shape index: {}]  }
   0x1   :  { %8 = vsyncpa [#allocation4], 0 }
   0x2   :  { %10 = vsyncpa [#allocation4 + $0x1], 0 }
   0x3   :  { %11 = vsyncpa [#allocation5], 0 }
   0x4   :  { %13 = vsyncpa [#allocation5 + $0x1], 0  ;;  %s650_s9 = smov 0   ;;  %s652_s10 = smov 0  }
   0x5   :  { %s654_s11 = smov 0   ;;  %s656_s12 = smov 0  }
   0x6 LB: > { %s671_s13 = sadd.s32 4294967295, %s620_s12   ;;  %s420_s14 = sadd.s32 4294967294, %s620_s12   ;;  %s620_s12 = sphi %s656_s12, %s890_s12   ;;  %s616_s11 = sphi %s654_s11, %s889_s11   ;;  %s612_s10 = sphi %s652_s10, %s888_s10   ;;  %s608_s9 = sphi %s650_s9, %s887_s9  }
   0x7   : > { %s675_s15 = sadd.s32 1, %s620_s12   ;;  %s47_s16 = sadd.s32 1, %s616_s11 }
   0x8   : > { %s44_s17 = ssub.s32 %s620_s12, %s675_s15  ;;  %p54_p0 = scmp.ne.s32.totalorder %s616_s11, %s612_s10 }
   0x9   : > { %p45_p1 = scmp.eq.s32.totalorder %s44_s17, 0  ;;  %p55_p2 = scmp.eq.s32.totalorder %s620_s12, 0 }
   0xa   : > { %p60_p3 = scmp.ne.s32.totalorder %s612_s10, %s608_s9  ;;  %p872_p4 = scmp.eq.s32.totalorder %s671_s13, 0 }
   0xb   : > { %s687_s18 = scalar_select %p45_p1, %s616_s11, %s47_s16  }
   0xc   : > { %p689_p5 = por %p55_p2, %p54_p0  ;;  %p695_p6 = por %p872_p4, %p60_p3 }
   0xd   : > { %p84_p7 = scmp.eq.s32.totalorder %s671_s13, 1  ;;  %p90_p8 = scmp.eq.s32.totalorder %s420_s14, 1 }
   0xe   : > { %s875_s20 = scalar_select %p695_p6, 1, 0 }
   0xf   : > { %p421_p9 = scmp.ge.s32.totalorder %s620_s12, 1  ;;  %p97_p10 = scmp.lt.s32.totalorder %s620_s12, 3 }
  0x10   : > { %p702_p11 = por %p84_p7, %p54_p0  ;;  %p706_p12 = por %p90_p8, %p60_p3 }
  0x11   : > { %p710_p13 = pnand %p421_p9, %p97_p10  ;;  %s110_s26 = sshll.u32 %s868_s0, 4  ;;  %s111_s26 = int_to_ptr.vmem [resolvable:$true] %s110_s26 }
  0x12   : > { %s876_s21 = scalar_select %p702_p11, 1, 0 }
  0x13   : > { %s877_s22 = scalar_select %p706_p12, 1, 0 }
  0x14   : > { %p446_p1 = pneg %p710_p13  ;;  %p459_p2 = scmp.lt.s32.totalorder %s620_s12, 2 }
  0x15   : > { %s121_s28 = sand.u32 1, %s616_s11   ;;  %s505_s3 = scalar_lea.vmem %s111_s26, 16 }
  0x16   : > { %p723_p7 = pnand %p446_p1, %p872_p4  ;;  %p730_p3 = pnand %p459_p2, %p689_p5 }
  0x17   : > { %s434_s30 = smul.u32 48, %s121_s28  ;;  %p506_p8 = scmp.ne.s32.totalorder %s111_s26, %s505_s3 }
  0x18   : > { %p507_p9 = pneg %p723_p7  ;;  %p513_p12 = scmp.lt.s32.totalorder %s111_s26, %s111_s26 }
  0x19   : > { %p514_p11 = scmp.lt.s32.totalorder %s505_s3, %s505_s3 }
  0x1a   : > { %p508_p10 = pnand %p507_p9, %p506_p8 }
  0x1b   : > { %p515_p1 = por %p514_p11, %p513_p12 }
  0x1c   : > { %p509_p0 = pneg %p508_p10 }
  0x1e   : > { %p516_p4 = pnand %p515_p1, %p509_p0 }
  0x20   : > { %519 = shalt.err (!%p516_p4)
}
  0x21   : > { %s622_s4 = smov [#allocation3]   ;;  %s435_s5 = smul.u32 768, %s620_s12 }
  0x22   : > { %449 = dma.vmem_to_smem (!%p723_p7), %s111_s26, 16, %s622_s4, [#allocation6]  }
  0x23   : > { %s125_s6 = scalar_lea.vmem [#allocation7], %s434_s30  ;;  %s744_s16 = scalar_lea.hbm %s869_s1, %s435_s5 }
  0x24   : > { %s132_s7 = sshll.u32 %s125_s6, 4  ;;  %s746_s17 = scalar_lea.sflag [#allocation4], %s121_s28  ;;  %s739_s7 = int_to_ptr.vmem [resolvable:$true] %s132_s7 }
  0x25   : > { %s520_s19 = scalar_lea.hbm %s744_s16, 768  ;;  %p522_p5 = pneg %p730_p3 }
  0x26   : > { %p521_p4 = scmp.ne.s32.totalorder %s744_s16, %s520_s19  ;;  %s525_s26 = scalar_lea.hbm %s869_s1, 1536 }
  0x27   : > { %p526_p0 = scmp.lt.u32.totalorder %s744_s16, %s869_s1  ;;  %p527_p2 = scmp.lt.u32.totalorder %s525_s26, %s520_s19 }
  0x28   : > { %p523_p11 = pnand %p522_p5, %p521_p4  ;;  %p529_p8 = scmp.lt.u32.totalorder %s520_s19, %s744_s16 }
  0x29   : > { %p528_p7 = por %p527_p2, %p526_p0 }
  0x2a   : > { %p524_p12 = pneg %p523_p11 }
  0x2b   : > { %p530_p9 = por %p529_p8, %p528_p7 }
  0x2d   : > { %p531_p10 = pnand %p530_p9, %p524_p12 }
  0x2f   : > { %534 = shalt.err (!%p531_p10)
}
  0x30   : > { %s535_s28 = scalar_lea.vmem %s739_s7, 768  ;;  %s623_s3 = smov [#allocation7]  }
  0x31   : > { %p536_p1 = scmp.ne.s32.totalorder %s739_s7, %s535_s28  ;;  %s540_s4 = sshll.u32 %s623_s3, 4  ;;  %s541_s4 = int_to_ptr.vmem [resolvable:$false] %s540_s4 }
  0x32   : > { %s542_s5 = scalar_lea.vmem %s541_s4, 1536  ;;  %p543_p6 = scmp.lt.s32.totalorder %s739_s7, %s541_s4 }
  0x33   : > { %p538_p4 = pnand %p536_p1, %p522_p5  ;;  %p544_p0 = scmp.lt.s32.totalorder %s542_s5, %s535_s28 }
  0x35   : > { %p539_p11 = pneg %p538_p4  ;;  %p545_p2 = por %p544_p0, %p543_p6 }
  0x37   : > { %p546_p7 = pnand %p545_p2, %p539_p11 }
  0x39   : > { %549 = shalt.err (!%p546_p7)
}
  0x3a   : > { %s624_s6 = smov 128   ;;  %s625_s8 = smov 8  }
  0x3b   : > { %453 = dma.hbm_to_vmem [thread:$0]  (!%p730_p3), %s744_s16, 768, %s739_s7, %s746_s17, %s624_s6, %s624_s6, %s625_s8  }
  0x3c   : > { %144 = sbr.rel (%p710_p13) target bundleno = 370 (0x172), region = 28  ;;  %p881_p5 = scmp.eq.s32.totalorder (!%p710_p13), %s671_s13, 0 }
  0x43   : > { %595 = dma.done.wait (%p881_p5), [#allocation6], 16   ;;  %p882_p12 = pmov %p881_p5 }
  0x44   : > { %s781_s14 = sand.u32 1, %s612_s10   ;;  %p883_p6 = scmp.ne.s32.totalorder %s875_s20, 0 }
  0x45   : > { %597 = vsyncadd (%p882_p12), [#allocation6], 4294967280  ;;  %s436_s19 = smul.u32 48, %s781_s14  ;;  %s151_s24 = scalar_lea.sflag [#allocation4], %s781_s14 }
  0x47   : > { %s154_s29 = scalar_lea.vmem [#allocation7], %s436_s19 }
  0x48   : > { %599 = dma.done.wait (%p883_p6), %s151_s24, 768  }
  0x49   : > { %601 = vsyncadd (%p883_p6), %s151_s24, 4294966528 }
  0x4a   : > { %159 = sfence }
  0x4b   : > { %v181_v0 = vld [vmem:[%s154_s29] sm:$0xff]  ;;  %v183_v1 = vld [vmem:[%s154_s29 + $0x10] sm:$0xff]  ;;  %vm187_vm0 = vcmask 130048   ;;  %v182_v6 = vld [vmem:[%s154_s29 + $0x8] sm:$0xff]  ;;  %vm176_vm1 = vcmask 162816   ;;  %vm179_vm2 = vcmask 158720  }
  0x4c   : > { %v185_v2 = vld [vmem:[%s154_s29 + $0x20] sm:$0xff]  ;;  %v188_v3 = vsel %vm187_vm0, %v181_v0, 0.0  ;;  %v189_v4 = vsel %vm187_vm0, %v183_v1, 0.0  ;;  %v184_v7 = vld [vmem:[%s154_s29 + $0x18] sm:$0xff]  ;;  %v186_v8 = vld [vmem:[%s154_s29 + $0x28] sm:$0xff]  ;;  %v193_v10 = vsel %vm187_vm0, %v182_v6, 0.0 }
  0x4d   : > { %v191_v5 = vsel %vm187_vm0, %v185_v2, 0.0  ;;  %v190_v9 = vadd.f32 %v189_v4, %v188_v3  ;;  %v194_v11 = vsel %vm187_vm0, %v184_v7, 0.0  ;;  %v196_v12 = vsel %vm187_vm0, %v186_v8, 0.0  ;;  %s627_s20 = smov 2   ;;  %s797_s23 = sld [smem:[#allocation3 + $0x2]] }
  0x4e   : > { %v195_v13 = vadd.f32 %v194_v11, %v193_v10  ;;  %v626_v15 = vmov 0.0   ;;  %vm206_vm3 = vcmask 146448   ;;  %vm215_vm4 = vcmask 1046528   ;;  %s799_s7 = sld [smem:[#allocation3 + $0x1]]  ;;  %s802_s16 = sld [smem:[#allocation3 + $0x3]] }
  0x4f   : > { %v192_v14 = vadd.f32 %v191_v5, %v190_v9  ;;  %177 = vst.msk [vmem:[#allocation2] sm:$0xff] %vm176_vm1, %v626_v15  ;;  %178 = vst.msk [vmem:[#allocation2 + $0x8] sm:$0xff] %vm176_vm1, %v626_v15  ;;  %vm225_vm5 = vcmask 1045504   ;;  %vm235_vm6 = vcmask 1044480   ;;  %vm245_vm7 = vcmask 1043456   ;;  %s430_s17 = sld [smem:[#allocation3 + $0x4]] }
  0x50   : > { %180 = vst.msk [vmem:[#allocation2 + $0x10] sm:$0xf] %vm179_vm2, %v626_v15  ;;  %v197_v16 = vadd.f32 %v196_v12, %v195_v13  ;;  %s628_s25 = smov 126   ;;  %s629_s26 = smov 127  }
  0x51   : > { %200 = vrot.lane.b32.xlu0 %v192_v14, %s627_s20  ;;  %s630_s27 = smov 125   ;;  %s631_s30 = smov 124  }
  0x52   : > { %s255_s28 = sld [smem:[#allocation3]]  ;;  %s175_s3 = scalar_lea.vmem [#allocation8], %s436_s19 }
  0x53   : > { %v274_v46 = vstv %s797_s23  ;;  %s335_s4 = sshll.u32 %s175_s3, 4  ;;  %s437_s5 = smul.u32 768, %s671_s13  ;;  %s816_s4 = int_to_ptr.vmem [resolvable:$true] %s335_s4 }
  0x54   : > { %v260_v48 = vstv %s799_s7  ;;  %v288_v54 = vstv %s802_s16  ;;  %s322_s13 = scalar_lea.sflag [#allocation5], %s781_s14  ;;  %s550_s24 = scalar_lea.vmem %s816_s4, 768 }
  0x55   : > { %202 = vrot.lane.b32.xlu0 %v197_v16, %s627_s20  ;;  %v302_v57 = vstv %s430_s17  ;;  %s821_s19 = scalar_lea.hbm %s870_s2, %s437_s5  ;;  %p551_p13 = scmp.ne.s32.totalorder %s816_s4, %s550_s24 }
  0x56   : > { %p884_p3 = scmp.ne.s32.totalorder %s876_s21, 0  ;;  %s632_s29 = smov [#allocation8]  }
  0x57   : > { %s554_s20 = sshll.u32 %s632_s29, 4  ;;  %s555_s20 = int_to_ptr.vmem [resolvable:$false] %s554_s20 }
  0x58   : > { %v256_v62 = vstv %s255_s28  ;;  %p552_p8 = pnand %p551_p13, %p884_p3  ;;  %s556_s23 = scalar_lea.vmem %s555_s20, 1536 }
  0x59   : > { %p557_p10 = scmp.lt.s32.totalorder %s816_s4, %s555_s20  ;;  %p558_p1 = scmp.lt.s32.totalorder %s556_s23, %s550_s24 }
  0x5a   : > { %p553_p9 = pneg %p552_p8 }
  0x5b   : > { %p559_p4 = por %p558_p1, %p557_p10 }
  0x5d   : > { %p560_p11 = pnand %p559_p4, %p553_p9 }
  0xc3   : > { %v201_v17 = vpop.permute.xlu0 %200 }
  0xc4   : > { %207 = vst.msk [vmem:[#allocation2 + $0x2] sm:$0xff] %vm206_vm3, %v201_v17 }
  0xc7   : > { %v203_v18 = vpop.permute.xlu0 %202 }
  0xc8   : > { %208 = vst.msk [vmem:[#allocation2 + $0xa] sm:$0xff] %vm206_vm3, %v203_v18 }
  0xcb   : > { %v209_v19 = vld [vmem:[#allocation2] sm:$0xff] }
  0xcc   : > { %v216_v22 = vrot.slane %v209_v19, 1  ;;  %v226_v28 = vrot.slane %v209_v19, 2  ;;  %v236_v34 = vrot.slane %v209_v19, 3  ;;  %v246_v40 = vrot.slane %v209_v19, 4 }
  0xcf   : > { %v210_v20 = vld [vmem:[#allocation2 + $0x8] sm:$0xff]  ;;  %v211_v21 = vld [vmem:[#allocation2 + $0x10] sm:$0xf] }
  0xd0   : > { %v217_v23 = vrot.slane %v210_v20, 1  ;;  %v227_v24 = vrot.slane %v210_v20, 2  ;;  %v219_v25 = vrot.slane %v211_v21, 1  ;;  %v229_v26 = vrot.slane %v211_v21, 2 }
  0xd1   : > { %v237_v29 = vrot.slane %v210_v20, 3  ;;  %v239_v32 = vrot.slane %v211_v21, 3  ;;  %v247_v35 = vrot.slane %v210_v20, 4  ;;  %v249_v42 = vrot.slane %v211_v21, 4 }
  0xd2   : > { %v218_v27 = vsel %vm215_vm4, %v216_v22, %v217_v23  ;;  %v220_v31 = vsel %vm215_vm4, %v217_v23, %v219_v25  ;;  %v228_v33 = vsel %vm225_vm5, %v226_v28, %v227_v24  ;;  %v230_v38 = vsel %vm225_vm5, %v227_v24, %v229_v26 }
  0xd3   : > { %v223_v30 = vadd.f32 %v218_v27, %v209_v19  ;;  %v224_v36 = vadd.f32 %v220_v31, %v210_v20  ;;  %v238_v39 = vsel %vm235_vm6, %v236_v34, %v237_v29  ;;  %v240_v44 = vsel %vm235_vm6, %v237_v29, %v239_v32 }
  0xd4   : > { %v248_v45 = vsel %vm245_vm7, %v246_v40, %v247_v35  ;;  %v250_v50 = vsel %vm245_vm7, %v247_v35, %v249_v42 }
  0xd5   : > { %v233_v37 = vadd.f32 %v228_v33, %v223_v30  ;;  %v234_v41 = vadd.f32 %v230_v38, %v224_v36 }
  0xd7   : > { %v243_v43 = vadd.f32 %v238_v39, %v233_v37  ;;  %v244_v47 = vadd.f32 %v240_v44, %v234_v41 }
  0xd9   : > { %v253_v49 = vadd.f32 %v248_v45, %v243_v43  ;;  %v254_v52 = vadd.f32 %v250_v50, %v244_v47 }
  0xdb   : > { %v275_v51 = vmul.f32 %v274_v46, %v253_v49  ;;  %v261_v53 = vmul.f32 %v260_v48, %v253_v49  ;;  %v262_v55 = vmul.f32 %v260_v48, %v254_v52  ;;  %v289_v56 = vmul.f32 %v288_v54, %v253_v49 }
  0xdc   : > { %v303_v58 = vmul.f32 %v302_v57, %v253_v49  ;;  %v276_v59 = vmul.f32 %v274_v46, %v254_v52  ;;  %v290_v60 = vmul.f32 %v288_v54, %v254_v52  ;;  %v304_v61 = vmul.f32 %v302_v57, %v254_v52 }
  0xdd   : > { %279 = vrot.lane.b32.xlu0 %v275_v51, %s628_s25  ;;  %265 = vrot.lane.b32.xlu1 %v261_v53, %s629_s26  ;;  %v257_v63 = vmul.f32 %v256_v62, %v253_v49  ;;  %v258_v9 = vmul.f32 %v256_v62, %v254_v52 }
  0xe1   : > { %293 = vrot.lane.b32.xlu0 %v289_v56, %s630_s27  ;;  %267 = vrot.lane.b32.xlu1 %v262_v55, %s629_s26 }
  0xe5   : > { %307 = vrot.lane.b32.xlu0 %v303_v58, %s631_s30  ;;  %281 = vrot.lane.b32.xlu1 %v276_v59, %s628_s25 }
  0xe9   : > { %295 = vrot.lane.b32.xlu1 %v290_v60, %s630_s27 }
  0xed   : > { %309 = vrot.lane.b32.xlu1 %v304_v61, %s631_s30 }
 0x14f   : > { %v280_v0 = vpop.permute.xlu0 %279  ;;  %v266_v1 = vpop.permute.xlu1 %265 }
 0x150   : > { %v271_v2 = vadd.f32 %v266_v1, %v257_v63 }
 0x152   : > { %v285_v3 = vadd.f32 %v280_v0, %v271_v2 }
 0x153   : > { %v294_v4 = vpop.permute.xlu0 %293  ;;  %v268_v5 = vpop.permute.xlu1 %267 }
 0x154   : > { %v299_v6 = vadd.f32 %v294_v4, %v285_v3  ;;  %v272_v11 = vadd.f32 %v268_v5, %v258_v9 }
 0x157   : > { %v308_v7 = vpop.permute.xlu0 %307  ;;  %v282_v8 = vpop.permute.xlu1 %281 }
 0x158   : > { %v313_v10 = vadd.f32 %v308_v7, %v299_v6  ;;  %v286_v13 = vadd.f32 %v282_v8, %v272_v11 }
 0x15a   : > { %315 = vst.msk [vmem:[%s175_s3] sm:$0xff] %vm187_vm0, %v313_v10  ;;  %317 = vst.msk [vmem:[%s175_s3 + $0x10] sm:$0xff] %vm187_vm0, %v313_v10 }
 0x15b   : > { %319 = vst.msk [vmem:[%s175_s3 + $0x20] sm:$0xff] %vm187_vm0, %v313_v10  ;;  %v296_v12 = vpop.permute.xlu1 %295 }
 0x15c   : > { %v300_v14 = vadd.f32 %v296_v12, %v286_v13 }
 0x15f   : > { %v310_v15 = vpop.permute.xlu1 %309 }
 0x160   : > { %v314_v16 = vadd.f32 %v310_v15, %v300_v14 }
 0x162   : > { %316 = vst.msk [vmem:[%s175_s3 + $0x8] sm:$0xff] %vm187_vm0, %v314_v16  ;;  %318 = vst.msk [vmem:[%s175_s3 + $0x18] sm:$0xff] %vm187_vm0, %v314_v16 }
 0x163   : > { %320 = vst.msk [vmem:[%s175_s3 + $0x28] sm:$0xff] %vm187_vm0, %v314_v16 }
 0x164   : > { %563 = shalt.err (!%p560_p11)
}
 0x165   : > { %s564_s7 = scalar_lea.hbm %s821_s19, 768  ;;  %s568_s25 = scalar_lea.hbm %s870_s2, 1536 }
 0x166   : > { %p565_p0 = scmp.ne.s32.totalorder %s821_s19, %s564_s7  ;;  %p569_p5 = scmp.lt.u32.totalorder %s821_s19, %s870_s2 }
 0x167   : > { %p570_p12 = scmp.lt.u32.totalorder %s568_s25, %s564_s7  ;;  %p572_p13 = scmp.lt.u32.totalorder %s564_s7, %s821_s19 }
 0x168   : > { %p566_p2 = pnand %p565_p0, %p884_p3 }
 0x169   : > { %p571_p6 = por %p570_p12, %p569_p5 }
 0x16a   : > { %p567_p7 = pneg %p566_p2 }
 0x16b   : > { %p573_p8 = por %p572_p13, %p571_p6 }
 0x16d   : > { %p574_p9 = pnand %p573_p8, %p567_p7 }
 0x16f   : > { %577 = shalt.err (!%p574_p9)
}
 0x170   : > { %s633_s30 = smov 128   ;;  %s634_s28 = smov 8  }
 0x171   : > { %444 = dma.vmem_to_hbm [thread:$0]  (%p884_p3), %s816_s4, 768, %s821_s19, %s322_s13, %s633_s30, %s633_s30, %s634_s28  }
 0x172 PF: > { %s350_s3 = sand.u32 1, %s608_s9   ;;  %p885_p10 = scmp.ne.s32.totalorder %s877_s22, 0 }
 0x173   : > { %p886_p1 = scmp.ge.s32.totalorder %s620_s12, 2  ;;  %s351_s5 = scalar_lea.sflag [#allocation5], %s350_s3 }
 0x175   : > { %p455_p4 = pnand %p886_p1, %p885_p10 }
 0x177   : > { %603 = dma.done.wait (!%p455_p4), %s351_s5, 768  }
 0x178   : > { %605 = vsyncadd (!%p455_p4), %s351_s5, 4294966528  ;;  %p16_p11 = scmp.ge.s32.totalorder %s675_s15, 4   ;;  %s887_s9 = smov %s612_s10 }
 0x179   : > { %s888_s10 = smov %s616_s11  ;;  %s889_s11 = smov %s687_s18 }
 0x17a   : > { %s890_s12 = smov %s675_s15  ;;  %18 = sbr.rel (!%p16_p11) target bundleno = 6 (0x6), region = 78 }
 0x181   :  { %356 = vsyncpa [#allocation4], 1 }
 0x182   :  { %358 = vsyncpa [#allocation4 + $0x1], 1 }
 0x183   :  { %359 = vsyncpa [#allocation5], 1 }
 0x184   :  { %361 = vsyncpa [#allocation5 + $0x1], 1 }
 0x185   :  { %362 = vsyncpa [#allocation6], 1 }
 0x186   :  { %364 = vsyncpa [#allocation6 + $0x1], 1 }

</bundles_post_ra>
